<compile_context>
chip_gen: v5e
topology: v5e:2x2
jax: 0.10.0
libtpu: 0.0.40
codegen_flags: <defaults>
</compile_context>

<pallas_src>
import jax
import jax.numpy as jnp
from jax.experimental import pallas as pl
from jax.experimental.pallas import tpu as pltpu


_LANE = 128          # TPU lane width; pad the output feature dim to this
_MAX_TB = 4096       # max batch-tile rows (VMEM-safe on every generation)


def _logreg_kernel(x_ref, w_ref, b_ref, o_ref):
    # Hot path: MXU matmul + VPU bias add + EUP sigmoid, one fused kernel.
    z = jnp.dot(x_ref[...], w_ref[...], preferred_element_type=jnp.float32)
    z = z + b_ref[...]                       # [TB, O_pad] + [1, O_pad]
    o_ref[...] = jax.nn.sigmoid(z).astype(o_ref.dtype)


def prepare_params(weight, bias):
    """One-time parameter prep (hoisted out of the per-call hot path).

    weight: [O, F] f32 (PyTorch nn.Linear layout), bias: [O] f32.
    Returns (w_t_padded [F, O_pad], b_padded [1, O_pad], O).
    """
    O, F = weight.shape
    o_pad = max(_LANE, ((O + _LANE - 1) // _LANE) * _LANE)
    w_t = jnp.zeros((F, o_pad), dtype=jnp.float32).at[:, :O].set(weight.T)
    b2 = jnp.zeros((1, o_pad), dtype=jnp.float32).at[:, :O].set(bias)
    return w_t, b2, O


def logistic_regression(x, w_t, b2, n_output):
    """x: [B, F] f32; w_t: [F, O_pad] f32; b2: [1, O_pad] f32."""
    B, F = x.shape
    o_pad = w_t.shape[1]

    # Batch tiling: biggest tile up to _MAX_TB rows, pad B up to a multiple.
    tb = B if B <= _MAX_TB else _MAX_TB
    b_pad = pl.cdiv(B, tb) * tb
    if b_pad != B:
        x = jnp.pad(x, ((0, b_pad - B), (0, 0)))

    out = pl.pallas_call(
        _logreg_kernel,
        out_shape=jax.ShapeDtypeStruct((b_pad, o_pad), jnp.float32),
        grid_spec=pl.GridSpec(
            grid=(b_pad // tb,),
            in_specs=[
                pl.BlockSpec((tb, F), lambda i: (i, 0)),       # x: tiled batch
                pl.BlockSpec((F, o_pad), lambda i: (0, 0)),    # W: resident
                pl.BlockSpec((1, o_pad), lambda i: (0, 0)),    # b: resident
            ],
            out_specs=pl.BlockSpec((tb, o_pad), lambda i: (i, 0)),
        ),
        compiler_params=pltpu.CompilerParams(
            dimension_semantics=("parallel",),
        ),
    )(x, w_t, b2)

    return out[:B, :n_output]


if __name__ == "__main__":
    # Small shapes consistent with the module: n_features=32, n_output=4, batch=8.
    B, F, O = 8, 32, 4
    key = jax.random.PRNGKey(0)
    kx, kw, kb = jax.random.split(key, 3)

    x = jax.random.normal(kx, (B, F), dtype=jnp.float32)
    # Deterministic parameter init (PyTorch Linear-style uniform bound 1/sqrt(F)).
    bound = 1.0 / (F ** 0.5)
    weight = jax.random.uniform(kw, (O, F), minval=-bound, maxval=bound,
                                dtype=jnp.float32)
    bias = jax.random.uniform(kb, (O,), minval=-bound, maxval=bound,
                              dtype=jnp.float32)

    # One-time parameter prep (transpose + lane padding), outside the hot path.
    w_t, b2, n_out = prepare_params(weight, bias)

    out = logistic_regression(x, w_t, b2, n_out)
    out = jax.block_until_ready(out)

    # Sanity check against plain-JAX reference.
    ref = jax.nn.sigmoid(x @ weight.T + bias)
    assert out.shape == (B, O)
    assert jnp.allclose(out, ref, atol=1e-6, rtol=1e-6)

    print("KERNEL_OK")
</pallas_src>

<mosaic_0001>
module attributes {stable_mosaic.version = 11 : i64} {
  func.func @_logreg_kernel(%arg0: i32, %arg1: memref<8x32xf32, #tpu.memory_space<vmem>>, %arg2: memref<32x128xf32, #tpu.memory_space<vmem>>, %arg3: memref<1x128xf32, #tpu.memory_space<vmem>>, %arg4: memref<8x128xf32, #tpu.memory_space<vmem>>) attributes {dimension_semantics = [#tpu.dimension_semantics<parallel>], iteration_bounds = array<i64: 1>, scalar_prefetch = 0 : i64, scratch_operands = 0 : i64, tpu.core_type = #tpu.core_type<tc>, window_params = [{transform_indices = @transform_0, window_bounds = array<i64: 8, 32>}, {pipeline_mode = #tpu.pipeline_mode<synchronous>, transform_indices = @transform_1, window_bounds = array<i64: 32, 128>}, {pipeline_mode = #tpu.pipeline_mode<synchronous>, transform_indices = @transform_2, window_bounds = array<i64: 1, 128>}, {transform_indices = @transform_3, window_bounds = array<i64: 8, 128>}]} {
    %c0 = arith.constant 0 : index
    %c0_0 = arith.constant 0 : index
    %0 = vector.load %arg1[%c0, %c0_0] : memref<8x32xf32, #tpu.memory_space<vmem>>, vector<8x32xf32>
    %c0_1 = arith.constant 0 : index
    %c0_2 = arith.constant 0 : index
    %1 = vector.load %arg2[%c0_1, %c0_2] : memref<32x128xf32, #tpu.memory_space<vmem>>, vector<32x128xf32>
    %cst = arith.constant dense<0.000000e+00> : vector<8x128xf32>
    %2 = tpu.matmul %0, %1, %cst {dimension_numbers = #tpu.dot_dimension_numbers<[1], [0], [0], [1], [0, 0, 1, 1], [], []>} : vector<8x32xf32>, vector<32x128xf32>, vector<8x128xf32> -> vector<8x128xf32>
    %c0_3 = arith.constant 0 : index
    %c0_4 = arith.constant 0 : index
    %3 = vector.load %arg3[%c0_3, %c0_4] : memref<1x128xf32, #tpu.memory_space<vmem>>, vector<1x128xf32>
    %4 = vector.broadcast %3 : vector<1x128xf32> to vector<8x128xf32>
    %5 = arith.addf %2, %4 : vector<8x128xf32>
    %6 = arith.negf %5 : vector<8x128xf32>
    %7 = math.exp %6 : vector<8x128xf32>
    %cst_5 = arith.constant 1.000000e+00 : f32
    %8 = vector.broadcast %cst_5 : f32 to vector<8x128xf32>
    %9 = arith.addf %8, %7 : vector<8x128xf32>
    %10 = arith.divf %8, %9 : vector<8x128xf32>
    %c0_6 = arith.constant 0 : index
    %c0_7 = arith.constant 0 : index
    %11 = vector.load %arg4[%c0_6, %c0_7] : memref<8x128xf32, #tpu.memory_space<vmem>>, vector<8x128xf32>
    tpu.vector_store %arg4[%c0_6, %c0_7], %10 {strides = array<i32>} : memref<8x128xf32, #tpu.memory_space<vmem>>, vector<8x128xf32>,
    return
  }
  func.func @transform_0(%arg0: i32) -> (i32, i32) {
    %c0_i32 = arith.constant 0 : i32
    %c0_i32_0 = arith.constant 0 : i32
    return %arg0, %c0_i32 : i32, i32
  }
  func.func @transform_1(%arg0: i32) -> (i32, i32) {
    %c0_i32 = arith.constant 0 : i32
    %c0_i32_0 = arith.constant 0 : i32
    %c0_i32_1 = arith.constant 0 : i32
    return %c0_i32, %c0_i32_0 : i32, i32
  }
  func.func @transform_2(%arg0: i32) -> (i32, i32) {
    %c0_i32 = arith.constant 0 : i32
    %c0_i32_0 = arith.constant 0 : i32
    %c0_i32_1 = arith.constant 0 : i32
    return %c0_i32, %c0_i32_0 : i32, i32
  }
  func.func @transform_3(%arg0: i32) -> (i32, i32) {
    %c0_i32 = arith.constant 0 : i32
    %c0_i32_0 = arith.constant 0 : i32
    return %arg0, %c0_i32 : i32, i32
  }
}

</mosaic_0001>

<bundles_post_ra>
// kernel: tpu_custom_call.1
= control target key start
LH: loop header
LB: loop body
LE: loop exit
PB: predicated region body
PF: predicated region fallthrough
CT: control target
= control target key end

     0   :  { %8 = vsyncpa [#allocation3], 0  ;;  %s243_s0 = inlined_call_operand.hbm [shape: f32[8,32], index: 0, kind: input, shape index: {}]   ;;  %s244_s1 = inlined_call_operand.hbm [shape: f32[32,128], index: 1, kind: input, shape index: {}]   ;;  %s245_s2 = inlined_call_operand.vmem [shape: f32[1,128], index: 2, kind: input, shape index: {}]   ;;  %s246_s3 = inlined_call_operand.hbm [shape: f32[8,128], index: 3, kind: output, shape index: {}]  }
   0x1   :  { %9 = vsyncpa [#allocation6], 0 }
   0x2   :  { %10 = vsyncpa [#allocation4], 0  ;;  %s16_s14 = sshll.u32 %s243_s0, 4  ;;  %s206_s15 = smov [#allocation2]   ;;  %s17_s14 = int_to_ptr.hbm [resolvable:$true] %s16_s14 }
   0x3   :  { %s18_s16 = sshll.u32 %s206_s15, 4  ;;  %s26_s19 = sshll.u32 %s244_s1, 4  ;;  %s19_s16 = int_to_ptr.vmem [resolvable:$true] %s18_s16  ;;  %s27_s19 = int_to_ptr.hbm [resolvable:$true] %s26_s19 }
   0x4   :  { %21 = dma.hbm_to_vmem [thread:$0]  %s17_s14, 128, %s19_s16, [#allocation3]  }
   0x5   :  { %s207_s20 = smov [#allocation5]   ;;  %s208_s22 = smov 128  }
   0x6   :  { %s28_s21 = sshll.u32 %s207_s20, 4  ;;  %s209_s23 = smov 8   ;;  %s29_s21 = int_to_ptr.vmem [resolvable:$true] %s28_s21 }
   0x7   :  { %34 = dma.hbm_to_vmem [thread:$0]  %s27_s19, 512, %s29_s21, [#allocation6], %s208_s22, %s208_s22, %s209_s23  }
   0x8   :  { %200 = dma.done.wait [#allocation3], 128  }
   0x9   :  { %201 = vsyncadd [#allocation3], 4294967168 }
   0xa   :  { %202 = dma.done.wait [#allocation6], 512  }
   0xb   :  { %203 = vsyncadd [#allocation6], 4294966784  ;;  %v49_v0 = vld [vmem:[#allocation5 + $0x18] sm:$0xff]  ;;  %v48_v1 = vld [vmem:[#allocation5 + $0x10] sm:$0xff]  ;;  %vm54_vm0 = vcmask 261120   ;;  %s210_s24 = smov [#allocation7]  }
   0xc   :  { %70 = vmatpush.msra.mxu0 %v49_v0  ;;  %v47_v2 = vld [vmem:[#allocation5 + $0x8] sm:$0xff]  ;;  %v46_v3 = vld [vmem:[#allocation5] sm:$0xff]  ;;  %v45_v4 = vld [vmem:[#allocation2] sm:$0xff]  ;;  %s103_s25 = sshll.u32 %s210_s24, 4  ;;  %s104_s25 = int_to_ptr.vmem [resolvable:$true] %s103_s25 }
   0xd   :  { %v123_v5 = vld [vmem:[%s245_s2] ss:$0 sm:$0xff]  ;;  %s105_s2 = sshll.u32 %s246_s3, 4  ;;  %s106_s2 = int_to_ptr.hbm [resolvable:$true] %s105_s2 }
   0xe   :  { %71 = vmatpush.msra.mxu0 %v48_v1 }
  0x10   :  { %72 = vmatpush.msra.mxu0 %v47_v2 }
  0x12   :  { %73 = vmatpush.msra.mxu0 %v46_v3 }
  0x13   :  { %116 = vmatmul.msk.f32.vlgmr.msra.gmra.mxu0 %vm54_vm0, %v45_v4 }
  0x90   :  { %v75_v6 = vpop.f32.mrf.mxu0 }
  0x91   :  { %v76_v7 = vadd.f32 %v123_v5, %v75_v6 }
  0x93   :  { %v117_v8 = vmul.f32 -1.442695, %v76_v7 }
  0x95   :  { %124 = vpow2.f32 %v117_v8 }
  0x9b   :  { %v125_v9 = vpop.eup %124 }
  0x9c   :  { %v81_v10 = vadd.f32 1.0, %v125_v9 }
  0x9e   :  { %126 = vrcp.f32 %v81_v10  ;;  %v93_v14 = vand.u32 2147483648, %v81_v10  ;;  %v91_v16 = vand.u32 2147483647, %v81_v10  ;;  %vm87_vm2 = vweird.f32 %v81_v10 }
  0xa0   :  { %v94_v18 = vor.u32 1.1754944e-38, %v93_v14  ;;  %vm92_vm4 = vcmp.eq.f32.partialorder %v91_v16, 8.507059e+37 }
  0xa4   :  { %v127_v11 = vpop.eup %126 }
  0xa5   :  { %v83_v12 = vmul.f32 %v127_v11, %v81_v10  ;;  %vm88_vm1 = vweird.f32 %v127_v11 }
  0xa6   :  { %vm89_vm3 = vmor %vm87_vm2, %vm88_vm1 }
  0xa7   :  { %v84_v13 = vsub.f32 1.0, %v83_v12 }
  0xa9   :  { %v85_v15 = vmul.f32 %v127_v11, %v84_v13 }
  0xab   :  { %v86_v17 = vadd.f32 %v127_v11, %v85_v15 }
  0xad   :  { %v90_v19 = vsel %vm89_vm3, %v127_v11, %v86_v17 }
  0xae   :  { %v95_v20 = vsel %vm92_vm4, %v94_v18, %v90_v19 }
  0xaf   :  { %97 = vst [vmem:[#allocation7] sm:$0xff] %v95_v20 }
  0xb0   :  { %108 = dma.vmem_to_hbm [thread:$0]  %s104_s25, 128, %s106_s2, [#allocation4]  }
  0xb1   :  { %204 = dma.done.wait [#allocation4], 128  }
  0xb2   :  { %205 = vsyncadd [#allocation4], 4294967168 }
  0xb3   :  { %113 = vsyncpa [#allocation3], 1 }
  0xb4   :  { %114 = vsyncpa [#allocation6], 1 }
  0xb5   :  { %115 = vsyncpa [#allocation4], 1 }

</bundles_post_ra>
